<compile_context>
chip_gen: v6e
topology: v6e:2x2x1
jax: 0.10.0
libtpu: 0.0.40
codegen_flags: <defaults>
</compile_context>

<pallas_src>
import functools

import jax
import jax.numpy as jnp
from jax.experimental import pallas as pl
from jax.experimental.pallas import tpu as pltpu

EPS = 1e-5  # nn.BatchNorm1d default eps


def blond_layer_kernel(xf_ref, w_ref, gamma_ref, beta_ref, valid_ref,
                       out_ref, col_ref, pool_ref, *, inv_count):
    """Fused Conv1d -> BatchNorm1d -> MaxPool1d -> ReLU (single resident block).

    xf_ref    : (N*(L+2), C_in)    zero-padded, channels-last, batch-flattened
    w_ref     : (3*C_in, C_out)    conv weights, the 3 taps folded into K
    gamma_ref : (1, C_out)         BN weight
    beta_ref  : (1, C_out)         BN bias
    valid_ref : (N*(L+2)-2, 1)     1.0 on rows that are real (n, l) conv outputs
    out_ref   : (N*L_out, C_out)   pooled + ReLU'd output (channels on lanes)
    col_ref   : VMEM scratch (N*(L+2)-2, 3*C_in)   in-VMEM im2col
    pool_ref  : VMEM scratch (N*(L+2), C_out) == (2*N*L_out, C_out)
    """
    rows_pad = xf_ref.shape[0]
    n_rows = rows_pad - 2                   # number of conv-output rows
    c_in = xf_ref.shape[-1]
    c_out = out_ref.shape[-1]
    n_out = out_ref.shape[0]                # N * L_out (== rows_pad // 2)

    # ---- Conv1d(k=3, s=1, p=1): stage the three row-shifted windows into the
    # VMEM im2col (lane-offset stores) and issue ONE K=3*C_in MXU matmul.
    # TODO(synk): the k=1,2 reads start at sublane offsets 1/2 (relayout);
    # form them with pltpu.roll on the otherwise-idle XLU if profiles show it.
    for k in range(3):                                          # static unroll
        col_ref[:, pl.ds(k * c_in, c_in)] = (
            xf_ref[pl.ds(k, n_rows), :].astype(col_ref.dtype))
    y = jnp.dot(col_ref[...], w_ref[...], preferred_element_type=jnp.float32)
    # NOTE: the conv bias is intentionally omitted -- training-mode BatchNorm
    # subtracts the per-channel batch mean, so a per-channel bias cancels
    # exactly.  (Eval-mode BN with running stats would need the bias back.)

    # ---- BatchNorm1d (training-mode batch statistics), single fused pass.
    # var = E[y^2] - E[y]^2 in f32; switch to a two-pass/shifted form if
    # |mean| >> std ever holds for this layer's activations.
    valid = valid_ref[...]                                      # (n_rows, 1)
    yv = y * valid                                              # mask junk rows
    s = jnp.sum(yv, axis=0, keepdims=True)                      # (1, C_out)
    ss = jnp.sum(yv * yv, axis=0, keepdims=True)                # (1, C_out)
    mean = s * inv_count
    var = ss * inv_count - mean * mean                          # biased variance
    scale = gamma_ref[...] * jax.lax.rsqrt(var + EPS)           # (1, C_out)
    shift = beta_ref[...] - mean * scale
    z = y * scale + shift                                       # one FMA / elem

    # ---- MaxPool1d(k=2, s=2, p=1) fused with ReLU (ReLU applied first; the
    # pool's -inf padding maps to 0 after ReLU).  Scratch row n*(L+2) + p holds
    # the ReLU'd value at sequence position p-1 (p in [1, L]) and 0 at the two
    # pool-padding rows p = 0 and p = L+1; since L is even, 2*L_out == L+2 so
    # output row q simply pools scratch rows (2q, 2q+1) across all batches.
    r = jnp.maximum(z, 0.0) * valid           # ReLU; junk rows -> 0 (= pool pad)
    zero_row = jnp.zeros((1, c_out), jnp.float32)
    pool_ref[pl.ds(0, 1), :] = zero_row                 # only the 2 rows the
    pool_ref[pl.ds(rows_pad - 1, 1), :] = zero_row      # shifted store misses
    pool_ref[pl.ds(1, n_rows), :] = r                   # single shifted store
    even = pool_ref[pl.ds(0, n_out, stride=2), :]       # rows 0,2,4,...
    odd = pool_ref[pl.ds(1, n_out, stride=2), :]        # rows 1,3,5,...
    out_ref[...] = jnp.maximum(even, odd).astype(out_ref.dtype)


def blond_conv_net_layer(x, w, b, gamma, beta, *, mxu_dtype=jnp.float32):
    """x: (N, C_in, L) f32 in PyTorch NCL layout. Returns (N, C_out, L_out).

    mxu_dtype: dtype of the MXU operands (im2col + weights).  jnp.bfloat16 is
    recommended on v6e/v7x (native MXU rate, halved operand footprint); BN
    statistics and normalisation are always f32.
    """
    N, C_in, L = x.shape
    C_out = w.shape[0]
    assert w.shape == (C_out, C_in, 3)
    assert L % 2 == 0, "pool staging assumes an even sequence length"
    # TODO(synk): odd seq_len needs a per-batch pool-scratch stride of L+1.
    L_out = L // 2 + 1   # conv keeps L (k=3,p=1,s=1); pool: floor(L/2)+1

    # ---- XLA-side glue (layout only, no math): NCL -> channels-last, zero-pad
    # the sequence by 1 on each side for the conv, flatten (batch, position).
    # TODO(synk): at real sizes keep the whole network channels-last so these
    # transposes/pads (full HBM round trips) disappear between layers.
    x_nlc = jnp.transpose(x, (0, 2, 1))                       # (N, L, C_in)
    x_pad = jnp.pad(x_nlc, ((0, 0), (1, 1), (0, 0)))          # (N, L+2, C_in)
    xf = x_pad.reshape(N * (L + 2), C_in)

    # Fold the 3 taps into K: w_cat[k*C_in + c, o] = w[o, c, k].
    w_cat = jnp.transpose(w, (2, 1, 0)).reshape(3 * C_in, C_out).astype(mxu_dtype)
    del b  # cancels under training-mode BatchNorm (see kernel comment)

    n_rows = N * (L + 2) - 2
    valid = (jnp.arange(n_rows) % (L + 2) < L).astype(jnp.float32)[:, None]

    kernel = functools.partial(blond_layer_kernel,
                               inv_count=1.0 / float(N * L))
    vmem = pl.BlockSpec(memory_space=pltpu.MemorySpace.VMEM)
    # TODO(synk): for production sizes replace this gridless resident block by
    # a row/batch grid ("parallel") with a two-phase BatchNorm and tiles sized
    # against v7x's 64 MiB VMEM via pltpu.CompilerParams(vmem_limit_bytes=...).
    out_flat = pl.pallas_call(
        kernel,
        out_shape=jax.ShapeDtypeStruct((N * L_out, C_out), jnp.float32),
        in_specs=[vmem] * 5,
        out_specs=vmem,
        scratch_shapes=[
            pltpu.VMEM((n_rows, 3 * C_in), mxu_dtype),          # im2col
            pltpu.VMEM((N * (L + 2), C_out), jnp.float32),      # pool staging
        ],
    )(xf, w_cat, gamma.reshape(1, C_out), beta.reshape(1, C_out), valid)

    # back to the module's NCL layout (pure XLA glue)
    return jnp.transpose(out_flat.reshape(N, L_out, C_out), (0, 2, 1))


def ref_forward(x, w, b, gamma, beta):
    """Pure-JAX reference replicating the PyTorch forward (NCL layout)."""
    y = jax.lax.conv_general_dilated(
        x, w, window_strides=(1,), padding=[(1, 1)],
        dimension_numbers=("NCH", "OIH", "NCH"))
    y = y + b[None, :, None]
    mean = y.mean(axis=(0, 2), keepdims=True)
    var = ((y - mean) ** 2).mean(axis=(0, 2), keepdims=True)
    y = (y - mean) / jnp.sqrt(var + EPS) * gamma[None, :, None] + beta[None, :, None]
    N, C, L = y.shape
    L_out = L // 2 + 1
    yp = jnp.pad(y, ((0, 0), (0, 0), (1, 1)), constant_values=-jnp.inf)
    yp = yp[:, :, : 2 * L_out].reshape(N, C, L_out, 2)
    return jnp.maximum(yp.max(axis=-1), 0.0)                  # (N, C_out, L_out)


if __name__ == "__main__":
    key = jax.random.PRNGKey(0)
    kx, kw, kb, kg, kbe = jax.random.split(key, 5)

    # BlondConvNetLayer(in_features=4, seq_len=16, out_features=32), batch=2
    N, C_in, L, C_out = 2, 4, 16, 32
    x = jax.random.normal(kx, (N, C_in, L), dtype=jnp.float32)
    w = jax.random.normal(kw, (C_out, C_in, 3), dtype=jnp.float32) * 0.2
    b = jax.random.normal(kb, (C_out,), dtype=jnp.float32) * 0.1
    gamma = 1.0 + 0.1 * jax.random.normal(kg, (C_out,), dtype=jnp.float32)
    beta = 0.1 * jax.random.normal(kbe, (C_out,), dtype=jnp.float32)

    ref = ref_forward(x, w, b, gamma, beta)                   # (N, C_out, L_out)

    # Default f32 MXU path: strict check against the pure-JAX reference.
    out = jax.block_until_ready(blond_conv_net_layer(x, w, b, gamma, beta))
    assert out.shape == ref.shape == (N, C_out, L // 2 + 1)
    max_err = float(jnp.max(jnp.abs(out - ref)))
    assert jnp.allclose(out, ref, atol=1e-4, rtol=1e-4), max_err

    # bf16 MXU operands (recommended on v6e/v7x); BN stays f32 -> loose check.
    out_bf16 = jax.block_until_ready(
        blond_conv_net_layer(x, w, b, gamma, beta, mxu_dtype=jnp.bfloat16))
    max_err_bf16 = float(jnp.max(jnp.abs(out_bf16 - ref)))
    assert jnp.allclose(out_bf16, ref, atol=1e-1, rtol=1e-1), max_err_bf16

    print("KERNEL_OK")
</pallas_src>

<mosaic_0001>
module attributes {stable_mosaic.version = 11 : i64} {
  func.func @blond_layer_kernel(%arg0: memref<36x4xf32, #tpu.memory_space<vmem>>, %arg1: memref<12x32xf32, #tpu.memory_space<vmem>>, %arg2: memref<1x32xf32, #tpu.memory_space<vmem>>, %arg3: memref<1x32xf32, #tpu.memory_space<vmem>>, %arg4: memref<34x1xf32, #tpu.memory_space<vmem>>, %arg5: memref<18x32xf32, #tpu.memory_space<vmem>>, %arg6: memref<34x12xf32, #tpu.memory_space<vmem>>, %arg7: memref<36x32xf32, #tpu.memory_space<vmem>>) attributes {dimension_semantics = [], scalar_prefetch = 0 : i64, scratch_operands = 2 : i64, tpu.core_type = #tpu.core_type<tc>} {
    %c0 = arith.constant 0 : index
    %c0_0 = arith.constant 0 : index
    %0 = vector.load %arg0[%c0, %c0_0] : memref<36x4xf32, #tpu.memory_space<vmem>>, vector<34x4xf32>
    %c0_1 = arith.constant 0 : index
    %c0_2 = arith.constant 0 : index
    %1 = vector.load %arg6[%c0_1, %c0_2] : memref<34x12xf32, #tpu.memory_space<vmem>>, vector<34x4xf32>
    tpu.vector_store %arg6[%c0_1, %c0_2], %0 {strides = array<i32>} : memref<34x12xf32, #tpu.memory_space<vmem>>, vector<34x4xf32>,
    %c1 = arith.constant 1 : index
    %c0_3 = arith.constant 0 : index
    %2 = vector.load %arg0[%c1, %c0_3] : memref<36x4xf32, #tpu.memory_space<vmem>>, vector<34x4xf32>
    %c0_4 = arith.constant 0 : index
    %c4 = arith.constant 4 : index
    %3 = vector.load %arg6[%c0_4, %c4] : memref<34x12xf32, #tpu.memory_space<vmem>>, vector<34x4xf32>
    tpu.vector_store %arg6[%c0_4, %c4], %2 {strides = array<i32>} : memref<34x12xf32, #tpu.memory_space<vmem>>, vector<34x4xf32>,
    %c2 = arith.constant 2 : index
    %c0_5 = arith.constant 0 : index
    %4 = vector.load %arg0[%c2, %c0_5] : memref<36x4xf32, #tpu.memory_space<vmem>>, vector<34x4xf32>
    %c0_6 = arith.constant 0 : index
    %c8 = arith.constant 8 : index
    %5 = vector.load %arg6[%c0_6, %c8] : memref<34x12xf32, #tpu.memory_space<vmem>>, vector<34x4xf32>
    tpu.vector_store %arg6[%c0_6, %c8], %4 {strides = array<i32>} : memref<34x12xf32, #tpu.memory_space<vmem>>, vector<34x4xf32>,
    %c0_7 = arith.constant 0 : index
    %c0_8 = arith.constant 0 : index
    %6 = vector.load %arg6[%c0_7, %c0_8] : memref<34x12xf32, #tpu.memory_space<vmem>>, vector<34x12xf32>
    %c0_9 = arith.constant 0 : index
    %c0_10 = arith.constant 0 : index
    %7 = vector.load %arg1[%c0_9, %c0_10] : memref<12x32xf32, #tpu.memory_space<vmem>>, vector<12x32xf32>
    %cst = arith.constant dense<0.000000e+00> : vector<34x32xf32>
    %8 = tpu.matmul %6, %7, %cst {dimension_numbers = #tpu.dot_dimension_numbers<[1], [0], [0], [1], [0, 0, 1, 1], [], []>} : vector<34x12xf32>, vector<12x32xf32>, vector<34x32xf32> -> vector<34x32xf32>
    %c0_11 = arith.constant 0 : index
    %c0_12 = arith.constant 0 : index
    %9 = vector.load %arg4[%c0_11, %c0_12] : memref<34x1xf32, #tpu.memory_space<vmem>>, vector<34x1xf32>
    %10 = vector.broadcast %9 : vector<34x1xf32> to vector<34x32xf32>
    %11 = arith.mulf %8, %10 : vector<34x32xf32>
    %cst_13 = arith.constant dense<0.000000e+00> : vector<32xf32>
    %12 = vector.multi_reduction <add>, %11, %cst_13 [0] : vector<34x32xf32> to vector<32xf32>
    %13 = vector.shape_cast %12 : vector<32xf32> to vector<1x32xf32>
    %14 = arith.mulf %11, %11 : vector<34x32xf32>
    %cst_14 = arith.constant dense<0.000000e+00> : vector<32xf32>
    %15 = vector.multi_reduction <add>, %14, %cst_14 [0] : vector<34x32xf32> to vector<32xf32>
    %16 = vector.shape_cast %15 : vector<32xf32> to vector<1x32xf32>
    %cst_15 = arith.constant 3.125000e-02 : f32
    %17 = vector.broadcast %cst_15 : f32 to vector<1x32xf32>
    %18 = arith.mulf %13, %17 : vector<1x32xf32>
    %cst_16 = arith.constant 3.125000e-02 : f32
    %19 = vector.broadcast %cst_16 : f32 to vector<1x32xf32>
    %20 = arith.mulf %16, %19 : vector<1x32xf32>
    %21 = arith.mulf %18, %18 : vector<1x32xf32>
    %22 = arith.subf %20, %21 : vector<1x32xf32>
    %c0_17 = arith.constant 0 : index
    %c0_18 = arith.constant 0 : index
    %23 = vector.load %arg2[%c0_17, %c0_18] : memref<1x32xf32, #tpu.memory_space<vmem>>, vector<1x32xf32>
    %cst_19 = arith.constant 9.99999974E-6 : f32
    %24 = vector.broadcast %cst_19 : f32 to vector<1x32xf32>
    %25 = arith.addf %22, %24 : vector<1x32xf32>
    %26 = math.rsqrt %25 : vector<1x32xf32>
    %27 = arith.mulf %23, %26 : vector<1x32xf32>
    %c0_20 = arith.constant 0 : index
    %c0_21 = arith.constant 0 : index
    %28 = vector.load %arg3[%c0_20, %c0_21] : memref<1x32xf32, #tpu.memory_space<vmem>>, vector<1x32xf32>
    %29 = arith.mulf %18, %27 : vector<1x32xf32>
    %30 = arith.subf %28, %29 : vector<1x32xf32>
    %31 = vector.broadcast %27 : vector<1x32xf32> to vector<34x32xf32>
    %32 = arith.mulf %8, %31 : vector<34x32xf32>
    %33 = vector.broadcast %30 : vector<1x32xf32> to vector<34x32xf32>
    %34 = arith.addf %32, %33 : vector<34x32xf32>
    %cst_22 = arith.constant 0.000000e+00 : f32
    %35 = vector.broadcast %cst_22 : f32 to vector<34x32xf32>
    %36 = arith.maximumf %34, %35 : vector<34x32xf32>
    %37 = vector.broadcast %9 : vector<34x1xf32> to vector<34x32xf32>
    %38 = arith.mulf %36, %37 : vector<34x32xf32>
    %cst_23 = arith.constant 0.000000e+00 : f32
    %39 = vector.broadcast %cst_23 : f32 to vector<1x32xf32>
    %c0_24 = arith.constant 0 : index
    %c0_25 = arith.constant 0 : index
    %40 = vector.load %arg7[%c0_24, %c0_25] : memref<36x32xf32, #tpu.memory_space<vmem>>, vector<1x32xf32>
    tpu.vector_store %arg7[%c0_24, %c0_25], %39 {strides = array<i32>} : memref<36x32xf32, #tpu.memory_space<vmem>>, vector<1x32xf32>,
    %c35 = arith.constant 35 : index
    %c0_26 = arith.constant 0 : index
    %41 = vector.load %arg7[%c35, %c0_26] : memref<36x32xf32, #tpu.memory_space<vmem>>, vector<1x32xf32>
    tpu.vector_store %arg7[%c35, %c0_26], %39 {strides = array<i32>} : memref<36x32xf32, #tpu.memory_space<vmem>>, vector<1x32xf32>,
    %c1_27 = arith.constant 1 : index
    %c0_28 = arith.constant 0 : index
    %42 = vector.load %arg7[%c1_27, %c0_28] : memref<36x32xf32, #tpu.memory_space<vmem>>, vector<34x32xf32>
    tpu.vector_store %arg7[%c1_27, %c0_28], %38 {strides = array<i32>} : memref<36x32xf32, #tpu.memory_space<vmem>>, vector<34x32xf32>,
    %c0_29 = arith.constant 0 : index
    %c0_30 = arith.constant 0 : index
    %43 = tpu.strided_load %arg7[%c0_29, %c0_30] {strides = array<i32: 2, 1>} : memref<36x32xf32, #tpu.memory_space<vmem>>, vector<18x32xf32>
    %c1_31 = arith.constant 1 : index
    %c0_32 = arith.constant 0 : index
    %44 = tpu.strided_load %arg7[%c1_31, %c0_32] {strides = array<i32: 2, 1>} : memref<36x32xf32, #tpu.memory_space<vmem>>, vector<18x32xf32>
    %45 = arith.maximumf %43, %44 : vector<18x32xf32>
    %c0_33 = arith.constant 0 : index
    %c0_34 = arith.constant 0 : index
    %46 = vector.load %arg5[%c0_33, %c0_34] : memref<18x32xf32, #tpu.memory_space<vmem>>, vector<18x32xf32>
    tpu.vector_store %arg5[%c0_33, %c0_34], %45 {strides = array<i32>} : memref<18x32xf32, #tpu.memory_space<vmem>>, vector<18x32xf32>,
    return
  }
}

</mosaic_0001>

<bundles_post_ra>
// kernel: tpu_custom_call.1
= control target key start
LH: loop header
LB: loop body
LE: loop exit
PB: predicated region body
PF: predicated region fallthrough
CT: control target
= control target key end

     0   :  { %s439_s22 = smov 4   ;;  %vm26_vm0 = vcmask 31744   ;;  %v440_v4 = vmov 0.0   ;;  %vm120_vm1 = vcmask 1043456   ;;  %vm441_vm2 = vmmov 0   ;;  %s442_s12 = smov 8   ;;  %s635_s0 = inlined_call_operand.vmem [shape: f32[36,4], index: 0, kind: input, shape index: {}]   ;;  %s636_s1 = inlined_call_operand.vmem [shape: f32[12,32], index: 1, kind: input, shape index: {}]   ;;  %s637_s2 = inlined_call_operand.vmem [shape: f32[1,32], index: 2, kind: input, shape index: {}]   ;;  %s638_s3 = inlined_call_operand.vmem [shape: f32[1,32], index: 3, kind: input, shape index: {}]   ;;  %s639_s4 = inlined_call_operand.vmem [shape: f32[34,1], index: 4, kind: input, shape index: {}]   ;;  %s640_s5 = inlined_call_operand.hbm [shape: f32[18,32], index: 5, kind: output, shape index: {}]  }
   0x1   :  { %v34_v0 = vld [vmem:[%s635_s0 + $0x9] sm:$0xff]  ;;  %v33_v1 = vld [vmem:[%s635_s0 + $0x1] sm:$0xff]  ;;  %383 = vmatprep.subr.mxu0 %v440_v4  ;;  %402 = vmatprep.subr.mxu1 %v440_v4  ;;  %v36_v6 = vld [vmem:[%s635_s0 + $0x19] sm:$0xff]  ;;  %vm31_vm3 = vcmask 25600  }
   0x2   :  { %45 = vrot.lane.b32.xlu1 %v34_v0, %s439_s22  ;;  %43 = vrot.lane.b32.xlu0 %v33_v1, %s439_s22  ;;  %v66_v2 = vld [vmem:[%s635_s0 + $0xa] sm:$0xff]  ;;  %v65_v3 = vld [vmem:[%s635_s0 + $0x2] sm:$0xff] }
   0x3   :  { %v22_v5 = vld [vmem:[%s635_s0 + $0x8] sm:$0xff]  ;;  %387 = vmatprep.mubr.msk.f32.mxu0 %vm441_vm2, %v440_v4  ;;  %396 = vmatprep.mubr.msk.f32.mxu1 %vm441_vm2, %v440_v4  ;;  %v21_v7 = vld [vmem:[%s635_s0] sm:$0xff]  ;;  %v24_v8 = vld [vmem:[%s635_s0 + $0x18] sm:$0xff] }
   0x4   :  { %28 = vst.msk [vmem:[#allocation2 + $0x8] sm:$0xff] %vm26_vm0, %v22_v5  ;;  %v23_v9 = vld [vmem:[%s635_s0 + $0x10] sm:$0xff]  ;;  %27 = vst.msk [vmem:[#allocation2] sm:$0xff] %vm26_vm0, %v21_v7  ;;  %v103_v10 = vld [vmem:[%s636_s1 + $0x8] sm:$0xf] }
   0x5   :  { %30 = vst.msk [vmem:[#allocation2 + $0x18] sm:$0xff] %vm26_vm0, %v24_v8  ;;  %29 = vst.msk [vmem:[#allocation2 + $0x10] sm:$0xff] %vm26_vm0, %v23_v9  ;;  %v102_v11 = vld [vmem:[%s636_s1] sm:$0xff]  ;;  %v35_v12 = vld [vmem:[%s635_s0 + $0x11] sm:$0xff]  ;;  %384 = vmatpush3.msk.msra.mxu0 %vm120_vm1, %v103_v10  ;;  %404 = vmatpush3.msk.msra.mxu1 %vm120_vm1, %v103_v10 }
   0x6   :  { %77 = vrot.lane.b32.xlu1 %v66_v2, %s442_s12  ;;  %75 = vrot.lane.b32.xlu0 %v65_v3, %s442_s12  ;;  %v25_v13 = vld [vmem:[%s635_s0 + $0x20] sm:$0x3] }
   0x7   :  { %10 = vsyncpa [#allocation5], 0  ;;  %385 = vmatprep.subr.mxu0 %v440_v4  ;;  %32 = vst.msk [vmem:[#allocation2 + $0x20] sm:$0x3] %vm31_vm3, %v25_v13  ;;  %403 = vmatprep.subr.mxu1 %v440_v4  ;;  %v68_v14 = vld [vmem:[%s635_s0 + $0x1a] sm:$0xff]  ;;  %v67_v15 = vld [vmem:[%s635_s0 + $0x12] sm:$0xff] }
   0x8   :  { %386 = vmatpush3.msra.mxu0 %v102_v11  ;;  %405 = vmatpush3.msra.mxu1 %v102_v11  ;;  %v37_v16 = vld [vmem:[%s635_s0 + $0x21] sm:$0x3]  ;;  %v443_v18 = vmov 0   ;;  %v215_v19 = vld [vmem:[%s639_s4 + $0x8] sm:$0xff]  ;;  %v216_v21 = vld [vmem:[%s639_s4 + $0x10] sm:$0xff]  ;;  %vm58_vm4 = vcmask 64544  }
   0x9   :  { %v69_v17 = vld [vmem:[%s635_s0 + $0x22] sm:$0x3]  ;;  %414 = vset.pattern.permute.xlu1 %v443_v18  ;;  %413 = vset.pattern.permute.xlu0 %v443_v18  ;;  %v217_v22 = vld [vmem:[%s639_s4 + $0x18] sm:$0xff]  ;;  %v218_v23 = vld [vmem:[%s639_s4 + $0x20] sm:$0x3]  ;;  %vm90_vm5 = vcmask 97344  }
   0xa   :  { %49 = vrot.lane.b32.xlu1 %v36_v6, %s439_s22  ;;  %47 = vrot.lane.b32.xlu0 %v35_v12, %s439_s22  ;;  %v214_v20 = vld [vmem:[%s639_s4] sm:$0xff]  ;;  %vm104_vm6 = vcmask 97280   ;;  %vm63_vm7 = vcmask 58400   ;;  %vm95_vm8 = vcmask 91200   ;;  %vm329_vm9 = vcmask 253952  }
   0xb   :  { %330 = vst.msk [vmem:[#allocation3] sm:$0x1] %vm329_vm9, %v440_v4  ;;  %331 = vst.msk [vmem:[#allocation3 + $0x23] sm:$0x1] %vm329_vm9, %v440_v4  ;;  %vm249_vm10 = vcmask 261120   ;;  %vm257_vm11 = vcmask 254976  }
   0xe   :  { %81 = vrot.lane.b32.xlu1 %v68_v14, %s442_s12  ;;  %79 = vrot.lane.b32.xlu0 %v67_v15, %s442_s12 }
  0x12   :  { %51 = vrot.lane.b32.xlu0 %v37_v16, %s439_s22  ;;  %83 = vrot.lane.b32.xlu1 %v69_v17, %s442_s12 }
  0x16   :  { %226 = vperm.xlu1 %414, %v215_v19   ;;  %221 = vperm.xlu0 %413, %v214_v20  }
  0x1a   :  { %231 = vperm.xlu1 %414, %v216_v21   ;;  %236 = vperm.xlu0 %413, %v217_v22  }
  0x1e   :  { %241 = vperm.xlu1 %414, %v218_v23  }
  0x74   :  { %v46_v24 = vpop.permute.xlu1 %45  ;;  %v44_v25 = vpop.permute.xlu0 %43 }
  0x75   :  { %60 = vst.msk [vmem:[#allocation2 + $0x8] sm:$0xff] %vm58_vm4, %v46_v24  ;;  %59 = vst.msk [vmem:[#allocation2] sm:$0xff] %vm58_vm4, %v44_v25 }
  0x78   :  { %v78_v26 = vpop.permute.xlu1 %77  ;;  %v76_v27 = vpop.permute.xlu0 %75 }
  0x79   :  { %92 = vst.msk [vmem:[#allocation2 + $0x8] sm:$0xff] %vm90_vm5, %v78_v26  ;;  %91 = vst.msk [vmem:[#allocation2] sm:$0xff] %vm90_vm5, %v76_v27 }
  0x7c   :  { %v50_v28 = vpop.permute.xlu1 %49  ;;  %v48_v29 = vpop.permute.xlu0 %47 }
  0x7d   :  { %62 = vst.msk [vmem:[#allocation2 + $0x18] sm:$0xff] %vm58_vm4, %v50_v28  ;;  %61 = vst.msk [vmem:[#allocation2 + $0x10] sm:$0xff] %vm58_vm4, %v48_v29 }
  0x80   :  { %v82_v30 = vpop.permute.xlu1 %81  ;;  %v80_v31 = vpop.permute.xlu0 %79  ;;  %v97_v32 = vld [vmem:[#allocation2] sm:$0xff]  ;;  %v98_v35 = vld [vmem:[#allocation2 + $0x8] sm:$0xff] }
  0x81   :  { %94 = vst.msk [vmem:[#allocation2 + $0x18] sm:$0xff] %vm90_vm5, %v82_v30  ;;  %93 = vst.msk [vmem:[#allocation2 + $0x10] sm:$0xff] %vm90_vm5, %v80_v31  ;;  %388 = vmatmul.mubr.msk.f32.vlgmr.msra.gmra.mxu0 %vm104_vm6, %v97_v32 }
  0x82   :  { %390 = vmatprep.mubr.msk.f32.mxu0 %vm441_vm2, %v440_v4 }
  0x84   :  { %v52_v33 = vpop.permute.xlu0 %51  ;;  %v84_v34 = vpop.permute.xlu1 %83 }
  0x85   :  { %64 = vst.msk [vmem:[#allocation2 + $0x20] sm:$0x3] %vm63_vm7, %v52_v33  ;;  %391 = vmatmul.mubr.msk.f32.gmra.mxu0 %vm104_vm6, %v98_v35  ;;  %v298_v35 = vlaneseq }
  0x86   :  { %96 = vst.msk [vmem:[#allocation2 + $0x20] sm:$0x3] %vm95_vm8, %v84_v34  ;;  %393 = vmatprep.mubr.msk.f32.mxu0 %vm441_vm2, %v440_v4 }
  0x88   :  { %v99_v36 = vld [vmem:[#allocation2 + $0x10] sm:$0xff]  ;;  %v100_v37 = vld [vmem:[#allocation2 + $0x18] sm:$0xff] }
  0x89   :  { %394 = vmatmul.mubr.msk.f32.gmra.mxu0 %vm104_vm6, %v99_v36  ;;  %397 = vmatmul.mubr.msk.f32.vlgmr.msra.gmra.mxu1 %vm104_vm6, %v100_v37  ;;  %v299_v36 = vshrl.u32 %v298_v35, 7  ;;  %v290_v37 = vld [vmem:[%s637_s2] sm:$0x1]  ;;  %s444_s2 = smov [#allocation4]  }
  0x8a   :  { %399 = vmatprep.mubr.msk.f32.mxu1 %vm441_vm2, %v440_v4 }
  0x8d   :  { %v101_v38 = vld [vmem:[#allocation2 + $0x20] sm:$0x3] }
  0x8e   :  { %400 = vmatmul.mubr.msk.f32.gmra.mxu1 %vm104_vm6, %v101_v38  ;;  %v300_v38 = vsub.s32 0, %v299_v36 }
  0x91   :  { %v579_v39 = vpop.permute.xlu0 %221  ;;  %v583_v41 = vpop.permute.xlu1 %226 }
  0x95   :  { %v591_v47 = vpop.permute.xlu0 %236  ;;  %v593_v49 = vpop.permute.xlu1 %231 }
  0x99   :  { %v602_v3 = vpop.permute.xlu1 %241 }
 0x141   :  { %v581_v40 = vpop.f32.mrf.mxu0 }
 0x142   :  { %v244_v43 = vmul.f32 %v579_v39, %v581_v40 }
 0x143   :  { %v389_v42 = vpop.f32.mrf.mxu0 }
 0x144   :  { %v266_v48 = vmul.f32 %v244_v43, %v244_v43  ;;  %v250_v54 = vsel %vm249_vm10, %v244_v43, 0.0 }
 0x145   :  { %v587_v44 = vpop.f32.mrf.mxu0 }
 0x146   :  { %v245_v45 = vmul.f32 %v583_v41, %v587_v44  ;;  %v271_v61 = vsel %vm249_vm10, %v266_v48, 0.0 }
 0x147   :  { %v392_v46 = vpop.f32.mrf.mxu0 }
 0x148   :  { %v251_v50 = vsel %vm249_vm10, %v245_v45, 0.0  ;;  %v267_v51 = vmul.f32 %v245_v45, %v245_v45  ;;  %v294_v45 = vld [vmem:[%s638_s3] sm:$0x1]  ;;  %s359_s3 = sshll.u32 %s444_s2, 4  ;;  %s360_s3 = int_to_ptr.vmem [resolvable:$true] %s359_s3 }
 0x149   :  { %v200_v52 = vpop.f32.mrf.mxu0  ;;  %v205_v53 = vpop.f32.mrf.mxu1  ;;  %v252_v58 = vadd.f32 %v251_v50, %v250_v54  ;;  %s417_s16 = scalar_lea.vmem %s360_s3, 384  ;;  %p422_p1 = scmp.lt.s32.totalorder %s360_s3, %s360_s3 }
 0x14a   :  { %v272_v55 = vsel %vm249_vm10, %v267_v51, 0.0  ;;  %v246_v56 = vmul.f32 %v593_v49, %v200_v52  ;;  %v247_v57 = vmul.f32 %v591_v47, %v205_v53  ;;  %p418_p0 = scmp.ne.s32.totalorder %s360_s3, %s417_s16  ;;  %p423_p2 = scmp.lt.s32.totalorder %s417_s16, %s417_s16 }
 0x14b   :  { %v395_v59 = vpop.f32.mrf.mxu0  ;;  %v398_v60 = vpop.f32.mrf.mxu1  ;;  %v273_v1 = vadd.f32 %v272_v55, %v271_v61 }
 0x14c   :  { %v253_v62 = vsel %vm249_vm10, %v246_v56, 0.0  ;;  %v268_v63 = vmul.f32 %v246_v56, %v246_v56  ;;  %v269_v0 = vmul.f32 %v247_v57, %v247_v57  ;;  %v255_v5 = vsel %vm249_vm10, %v247_v57, 0.0  ;;  %p424_p3 = por %p423_p2, %p422_p1 }
 0x14d   :  { %v254_v2 = vadd.f32 %v253_v62, %v252_v58 }
 0x14e   :  { %v274_v4 = vsel %vm249_vm10, %v268_v63, 0.0  ;;  %v210_v6 = vpop.f32.mrf.mxu1  ;;  %v276_v10 = vsel %vm249_vm10, %v269_v0, 0.0  ;;  %p425_p4 = pnand %p424_p3, %p418_p0 }
 0x14f   :  { %v275_v7 = vadd.f32 %v274_v4, %v273_v1  ;;  %v256_v8 = vadd.f32 %v255_v5, %v254_v2  ;;  %v248_v9 = vmul.f32 %v602_v3, %v210_v6 }
 0x150   :  { %v401_v11 = vpop.f32.mrf.mxu1 }
 0x151   :  { %v277_v12 = vadd.f32 %v276_v10, %v275_v7  ;;  %v258_v13 = vsel %vm257_vm11, %v248_v9, 0.0  ;;  %v270_v14 = vmul.f32 %v248_v9, %v248_v9 }
 0x152   :  { %v259_v15 = vadd.f32 %v258_v13, %v256_v8 }
 0x153   :  { %v278_v16 = vsel %vm257_vm11, %v270_v14, 0.0 }
 0x154   :  { %v260_v17 = vrot.slane %v259_v15, 4  ;;  %v279_v18 = vadd.f32 %v278_v16, %v277_v12 }
 0x156   :  { %v261_v19 = vadd.f32 %v260_v17, %v259_v15  ;;  %v280_v20 = vrot.slane %v279_v18, 4 }
 0x158   :  { %v262_v21 = vrot.slane %v261_v19, 2  ;;  %v281_v22 = vadd.f32 %v280_v20, %v279_v18 }
 0x15a   :  { %v263_v23 = vadd.f32 %v262_v21, %v261_v19  ;;  %v282_v24 = vrot.slane %v281_v22, 2 }
 0x15c   :  { %v264_v25 = vrot.slane %v263_v23, 1  ;;  %v283_v26 = vadd.f32 %v282_v24, %v281_v22 }
 0x15e   :  { %v265_v27 = vadd.f32 %v264_v25, %v263_v23  ;;  %v284_v28 = vrot.slane %v283_v26, 1 }
 0x160   :  { %v285_v29 = vadd.f32 %v284_v28, %v283_v26  ;;  %v286_v30 = vmul.f32 0.03125, %v265_v27 }
 0x162   :  { %v287_v31 = vmul.f32 0.03125, %v285_v29  ;;  %v288_v32 = vmul.f32 %v286_v30, %v286_v30 }
 0x164   :  { %v289_v33 = vsub.f32 %v287_v31, %v288_v32 }
 0x166   :  { %v291_v34 = vadd.f32 1e-05, %v289_v33 }
 0x168   :  { %415 = vrsqrt.f32 %v291_v34 }
 0x175   :  { %v416_v42 = vpop.eup %415 }
 0x176   :  { %v293_v43 = vmul.f32 %v416_v42, %v290_v37 }
 0x178   :  { %v295_v46 = vmul.f32 %v293_v43, %v286_v30  ;;  %v301_v48 = vrot.slane %v293_v43, %v300_v38 }
 0x17a   :  { %v296_v50 = vsub.f32 %v294_v45, %v295_v46  ;;  %v303_v51 = vmul.f32 %v301_v48, %v581_v40  ;;  %v304_v54 = vmul.f32 %v301_v48, %v587_v44  ;;  %v305_v55 = vmul.f32 %v301_v48, %v200_v52 }
 0x17b   :  { %v306_v56 = vmul.f32 %v301_v48, %v205_v53  ;;  %v307_v58 = vmul.f32 %v301_v48, %v210_v6 }
 0x17c   :  { %v312_v57 = vrot.slane %v296_v50, %v300_v38 }
 0x17e   :  { %v314_v59 = vadd.f32 %v312_v57, %v303_v51  ;;  %v315_v60 = vadd.f32 %v312_v57, %v304_v54  ;;  %v316_v61 = vadd.f32 %v312_v57, %v305_v55  ;;  %v317_v62 = vadd.f32 %v312_v57, %v306_v56 }
 0x17f   :  { %v318_v63 = vadd.f32 %v312_v57, %v307_v58 }
 0x180   :  { %v319_v0 = vmax.f32 %v314_v59, 0.0  ;;  %v320_v1 = vmax.f32 %v315_v60, 0.0  ;;  %v321_v2 = vmax.f32 %v316_v61, 0.0  ;;  %v322_v4 = vmax.f32 %v317_v62, 0.0 }
 0x181   :  { %v323_v5 = vmax.f32 %v318_v63, 0.0 }
 0x182   :  { %v324_v7 = vmul.f32 %v319_v0, %v579_v39  ;;  %v325_v40 = vmul.f32 %v320_v1, %v583_v41  ;;  %v326_v44 = vmul.f32 %v321_v2, %v593_v49  ;;  %v327_v52 = vmul.f32 %v322_v4, %v591_v47 }
 0x183   :  { %v328_v53 = vmul.f32 %v323_v5, %v602_v3 }
 0x184   :  { %332 = vst.msk [vmem:[#allocation3 + $0x1] sm:$0xff] %vm249_vm10, %v324_v7  ;;  %333 = vst.msk [vmem:[#allocation3 + $0x9] sm:$0xff] %vm249_vm10, %v325_v40 }
 0x185   :  { %334 = vst.msk [vmem:[#allocation3 + $0x11] sm:$0xff] %vm249_vm10, %v326_v44  ;;  %335 = vst.msk [vmem:[#allocation3 + $0x19] sm:$0xff] %vm249_vm10, %v327_v52 }
 0x186   :  { %336 = vst.msk [vmem:[#allocation3 + $0x21] sm:$0x3] %vm257_vm11, %v328_v53 }
 0x18b   :  { %v337_v39 = vld [vmem:[#allocation3] ss:$2 sm:$0xff]  ;;  %v343_v6 = vld [vmem:[#allocation3 + $0x1] ss:$2 sm:$0xff] }
 0x18c   :  { %v339_v41 = vld [vmem:[#allocation3 + $0x10] ss:$2 sm:$0xff]  ;;  %v345_v8 = vld [vmem:[#allocation3 + $0x11] ss:$2 sm:$0xff]  ;;  %v348_v47 = vmax.f32 %v337_v39, %v343_v6 }
 0x18d   :  { %v341_v49 = vld [vmem:[#allocation3 + $0x20] ss:$2 sm:$0x3]  ;;  %v347_v9 = vld [vmem:[#allocation3 + $0x21] ss:$2 sm:$0x3]  ;;  %v349_v3 = vmax.f32 %v339_v41, %v345_v8 }
 0x18e   :  { %v350_v10 = vmax.f32 %v341_v49, %v347_v9  ;;  %351 = vst.msk [vmem:[#allocation4] sm:$0xff] %vm249_vm10, %v348_v47 }
 0x18f   :  { %352 = vst.msk [vmem:[#allocation4 + $0x8] sm:$0xff] %vm249_vm10, %v349_v3 }
 0x190   :  { %353 = vst.msk [vmem:[#allocation4 + $0x10] sm:$0x3] %vm257_vm11, %v350_v10 }
 0x191   :  { %428 = shalt.err (!%p425_p4)
}
 0x192   :  { %s445_s17 = smov 128  }
 0x193   :  { %365 = dma.vmem_to_hbm [thread:$0]  %s360_s3, 384, %s640_s5, [#allocation5], %s445_s17, %s445_s17, %s442_s12  }
 0x194   :  { %437 = dma.done.wait [#allocation5], 384  }
 0x195   :  { %438 = vsyncadd [#allocation5], 4294966912 }
 0x196   :  { %369 = vsyncpa [#allocation5], 1 }

</bundles_post_ra>
